<compile_context>
chip_gen: v7x
topology: tpu7x:2x2x1
jax: 0.10.0
libtpu: 0.0.40
codegen_flags: <defaults>
</compile_context>

<pallas_src>
import functools

import numpy as np
import jax
import jax.numpy as jnp
from jax.experimental import pallas as pl
from jax.experimental.pallas import tpu as pltpu


def _pos_pow(x, g):
    # x ** g for x >= 0 (with 0 ** g == 0); robust exp/log lowering on TPU (EUP).
    safe = jnp.where(x > 0.0, x, 1.0)
    return jnp.where(x > 0.0, jnp.exp(g * jnp.log(safe)), 0.0)


# --------------------------------------------------------------------------
# Fused MLC kernel: spectrogram ** gammas[0] + all gamm_trsfm layers.
#   frames_ref : (tr, n)   raw (un-windowed) frames
#   cs_ref     : (n, 2n)   [diag(win_norm) @ cos | diag(win_norm) @ sin]
#   dft_lp_ref : (n, n)    ortho DFT real part, lowpass edge columns zeroed
#   dft_hp_ref : (n, n)    ortho DFT real part, hipass edge columns zeroed
#   out_refs   : (ceps, spec) or (spec,) when there are no gamm layers
# --------------------------------------------------------------------------
def _mlc_kernel(frames_ref, cs_ref, dft_lp_ref, dft_hp_ref, *out_refs,
                gamma0, g_late, n_layers, n):
    # Spectrogram: one wide matmul, re/im are lane-aligned halves of the result.
    y = jnp.dot(frames_ref[...], cs_ref[...], preferred_element_type=jnp.float32)
    re = y[:, :n]
    im = y[:, n:]                                  # sign irrelevant (squared)
    spec = _pos_pow(re * re + im * im, gamma0)     # power=2 spectrogram ** gammas[0]

    if n_layers == 0:
        (spec_ref,) = out_refs
        spec_ref[...] = spec
        return

    ceps_ref, spec_ref = out_refs
    ceps = None
    # gamm_trsfm layers, unrolled at trace time; intermediates stay in VMEM/vregs.
    for d in range(n_layers):
        if d % 2:
            z = jnp.dot(ceps, dft_hp_ref[...], preferred_element_type=jnp.float32)
            spec = _pos_pow(jnp.maximum(z, 0.0), g_late)
        else:
            z = jnp.dot(spec, dft_lp_ref[...], preferred_element_type=jnp.float32)
            ceps = _pos_pow(jnp.maximum(z, 0.0), g_late)

    ceps_ref[...] = ceps
    spec_ref[...] = spec


def mlc_fused(frames, cs, dft_lp, dft_hp, gamma0, g_late, n_layers, *, tr):
    rows, n = frames.shape
    assert rows % tr == 0 and tr % 8 == 0

    kernel = functools.partial(
        _mlc_kernel, gamma0=gamma0, g_late=g_late, n_layers=n_layers, n=n)

    in_specs = [
        pl.BlockSpec((tr, n), lambda i: (i, 0)),       # frames tile (streamed)
        pl.BlockSpec((n, 2 * n), lambda i: (0, 0)),    # windowed cos|sin (resident)
        pl.BlockSpec((n, n), lambda i: (0, 0)),        # lowpass-masked ortho DFT
        pl.BlockSpec((n, n), lambda i: (0, 0)),        # hipass-masked ortho DFT
    ]
    out_tile = pl.BlockSpec((tr, n), lambda i: (i, 0))
    if n_layers == 0:
        out_shape = jax.ShapeDtypeStruct((rows, n), jnp.float32)
        out_specs = out_tile
    else:
        out_shape = (jax.ShapeDtypeStruct((rows, n), jnp.float32),
                     jax.ShapeDtypeStruct((rows, n), jnp.float32))
        out_specs = (out_tile, out_tile)

    return pl.pallas_call(
        kernel,
        out_shape=out_shape,
        grid_spec=pltpu.PrefetchScalarGridSpec(
            num_scalar_prefetch=0,
            grid=(rows // tr,),
            in_specs=in_specs,
            out_specs=out_specs,
        ),
        compiler_params=pltpu.CompilerParams(dimension_semantics=("parallel",)),
    )(frames, cs, dft_lp, dft_hp)


# --------------------------------------------------------------------------
# MLC forward (matches the PyTorch module semantics)
# --------------------------------------------------------------------------
def mlc_forward(x, *, n_fft, sr, gammas, hop_size, hipass_f=50.0, lowpass_t=0.24):
    B, L = x.shape
    n, hop = n_fft, hop_size
    hpi = int(hipass_f * n_fft / sr) + 1
    lpi = int(lowpass_t * sr / 1000) + 1

    # ---- deterministic constants ("parameters"), built on host --------------
    j = np.arange(n)
    win = 0.5 - 0.5 * np.cos(2.0 * np.pi * j / n)               # periodic Hann
    win_scaled = win / np.sqrt(np.sum(win ** 2))                # normalized=True
    ang = 2.0 * np.pi * np.outer(j, j) / n

    # window folded into the DFT (diag(win) @ DFT); cos|sin concatenated
    cos_w = win_scaled[:, None] * np.cos(ang)
    sin_w = win_scaled[:, None] * np.sin(ang)
    cs = np.concatenate([cos_w, sin_w], axis=1).astype(np.float32)   # (n, 2n)

    # ortho real DFT with edge masks folded into the output columns
    dft = np.cos(ang) / np.sqrt(n)
    def masked_dft(i):
        m = dft.copy()
        m[:, :i] = 0.0
        m[:, n - i:] = 0.0
        return m.astype(np.float32)
    dft_lp = masked_dft(lpi)
    dft_hp = masked_dft(hpi)

    # ---- framing glue (torch.stft center=True, reflect pad) -- plain JAX ----
    xp = jnp.pad(x, ((0, 0), (n // 2, n // 2)), mode="reflect")
    T = 1 + L // hop
    idx = jnp.arange(T)[:, None] * hop + jnp.arange(n)[None, :]
    frames = xp[:, idx].reshape(B * T, n).astype(jnp.float32)

    # ---- row tiling: large tiles, rows padded to a multiple of the tile -----
    rows = B * T
    tr = min(512, ((rows + 7) // 8) * 8)
    rows_p = ((rows + tr - 1) // tr) * tr
    if rows_p != rows:
        frames = jnp.pad(frames, ((0, rows_p - rows), (0, 0)))

    n_layers = len(gammas) - 1
    # NOTE: the PyTorch lambdas capture `gamma` by reference (late binding), so
    # every gamm_trsfm layer effectively uses gammas[-1]; reproduced exactly.
    g_late = float(gammas[-1])

    out = mlc_fused(frames, jnp.asarray(cs), jnp.asarray(dft_lp),
                    jnp.asarray(dft_hp), float(gammas[0]), g_late,
                    n_layers, tr=tr)

    if n_layers == 0:
        spec = out[:rows].reshape(B, T, n)
        return None, spec
    ceps_p, spec_p = out
    ceps = ceps_p[:rows].reshape(B, T, n)
    spec = spec_p[:rows].reshape(B, T, n)
    return ceps, spec


if __name__ == "__main__":
    n_fft, sr, hop = 128, 8000, 64
    gammas = [0.24, 0.6, 0.6, 0.6]          # post-layer gammas equal (late binding)
    B, L = 2, 448                           # -> T = 1 + L//hop = 8 frames

    x = jax.random.normal(jax.random.PRNGKey(0), (B, L), dtype=jnp.float32)

    ceps, spec = mlc_forward(x, n_fft=n_fft, sr=sr, gammas=gammas, hop_size=hop)
    ceps, spec = jax.block_until_ready((ceps, spec))

    T = 1 + L // hop
    assert ceps.shape == (B, T, n_fft) and spec.shape == (B, T, n_fft)
    assert bool(jnp.isfinite(ceps).all()) and bool(jnp.isfinite(spec).all())
    print("KERNEL_OK")
</pallas_src>

<mosaic_0001>
module attributes {stable_mosaic.version = 11 : i64} {
  func.func @_mlc_kernel(%arg0: i32, %arg1: memref<16x128xf32, #tpu.memory_space<vmem>>, %arg2: memref<128x256xf32, #tpu.memory_space<vmem>>, %arg3: memref<128x128xf32, #tpu.memory_space<vmem>>, %arg4: memref<128x128xf32, #tpu.memory_space<vmem>>, %arg5: memref<16x128xf32, #tpu.memory_space<vmem>>, %arg6: memref<16x128xf32, #tpu.memory_space<vmem>>) attributes {dimension_semantics = [#tpu.dimension_semantics<parallel>], iteration_bounds = array<i64: 1>, scalar_prefetch = 0 : i64, scratch_operands = 0 : i64, tpu.core_type = #tpu.core_type<tc>, window_params = [{transform_indices = @transform_0, window_bounds = array<i64: 16, 128>}, {pipeline_mode = #tpu.pipeline_mode<synchronous>, transform_indices = @transform_1, window_bounds = array<i64: 128, 256>}, {pipeline_mode = #tpu.pipeline_mode<synchronous>, transform_indices = @transform_2, window_bounds = array<i64: 128, 128>}, {pipeline_mode = #tpu.pipeline_mode<synchronous>, transform_indices = @transform_3, window_bounds = array<i64: 128, 128>}, {transform_indices = @transform_4, window_bounds = array<i64: 16, 128>}, {transform_indices = @transform_5, window_bounds = array<i64: 16, 128>}]} {
    %c0 = arith.constant 0 : index
    %c0_0 = arith.constant 0 : index
    %0 = vector.load %arg1[%c0, %c0_0] : memref<16x128xf32, #tpu.memory_space<vmem>>, vector<16x128xf32>
    %c0_1 = arith.constant 0 : index
    %c0_2 = arith.constant 0 : index
    %1 = vector.load %arg2[%c0_1, %c0_2] : memref<128x256xf32, #tpu.memory_space<vmem>>, vector<128x256xf32>
    %cst = arith.constant dense<0.000000e+00> : vector<16x256xf32>
    %2 = tpu.matmul %0, %1, %cst {dimension_numbers = #tpu.dot_dimension_numbers<[1], [0], [0], [1], [0, 0, 1, 1], [], []>} : vector<16x128xf32>, vector<128x256xf32>, vector<16x256xf32> -> vector<16x256xf32>
    %3 = vector.extract_strided_slice %2 {offsets = [0, 0], sizes = [16, 128], strides = [1, 1]} : vector<16x256xf32> to vector<16x128xf32>
    %4 = vector.extract_strided_slice %2 {offsets = [0, 128], sizes = [16, 128], strides = [1, 1]} : vector<16x256xf32> to vector<16x128xf32>
    %5 = arith.mulf %3, %3 : vector<16x128xf32>
    %6 = arith.mulf %4, %4 : vector<16x128xf32>
    %7 = arith.addf %5, %6 : vector<16x128xf32>
    %cst_3 = arith.constant 0.000000e+00 : f32
    %8 = vector.broadcast %cst_3 : f32 to vector<16x128xf32>
    %9 = arith.cmpf ogt, %7, %8 : vector<16x128xf32>
    %cst_4 = arith.constant 1.000000e+00 : f32
    %10 = vector.broadcast %cst_4 : f32 to vector<16x128xf32>
    %11 = arith.select %9, %7, %10 : vector<16x128xi1>, vector<16x128xf32>
    %cst_5 = arith.constant 0.000000e+00 : f32
    %12 = vector.broadcast %cst_5 : f32 to vector<16x128xf32>
    %13 = arith.cmpf ogt, %7, %12 : vector<16x128xf32>
    %14 = math.log %11 : vector<16x128xf32>
    %cst_6 = arith.constant 2.400000e-01 : f32
    %15 = vector.broadcast %cst_6 : f32 to vector<16x128xf32>
    %16 = arith.mulf %15, %14 : vector<16x128xf32>
    %17 = math.exp %16 : vector<16x128xf32>
    %cst_7 = arith.constant 0.000000e+00 : f32
    %18 = vector.broadcast %cst_7 : f32 to vector<16x128xf32>
    %19 = arith.select %13, %17, %18 : vector<16x128xi1>, vector<16x128xf32>
    %c0_8 = arith.constant 0 : index
    %c0_9 = arith.constant 0 : index
    %20 = vector.load %arg3[%c0_8, %c0_9] : memref<128x128xf32, #tpu.memory_space<vmem>>, vector<128x128xf32>
    %cst_10 = arith.constant dense<0.000000e+00> : vector<16x128xf32>
    %21 = tpu.matmul %19, %20, %cst_10 {dimension_numbers = #tpu.dot_dimension_numbers<[1], [0], [0], [1], [0, 0, 1, 1], [], []>} : vector<16x128xf32>, vector<128x128xf32>, vector<16x128xf32> -> vector<16x128xf32>
    %cst_11 = arith.constant 0.000000e+00 : f32
    %22 = vector.broadcast %cst_11 : f32 to vector<16x128xf32>
    %23 = arith.maximumf %21, %22 : vector<16x128xf32>
    %cst_12 = arith.constant 0.000000e+00 : f32
    %24 = vector.broadcast %cst_12 : f32 to vector<16x128xf32>
    %25 = arith.cmpf ogt, %23, %24 : vector<16x128xf32>
    %cst_13 = arith.constant 1.000000e+00 : f32
    %26 = vector.broadcast %cst_13 : f32 to vector<16x128xf32>
    %27 = arith.select %25, %23, %26 : vector<16x128xi1>, vector<16x128xf32>
    %cst_14 = arith.constant 0.000000e+00 : f32
    %28 = vector.broadcast %cst_14 : f32 to vector<16x128xf32>
    %29 = arith.cmpf ogt, %23, %28 : vector<16x128xf32>
    %30 = math.log %27 : vector<16x128xf32>
    %cst_15 = arith.constant 6.000000e-01 : f32
    %31 = vector.broadcast %cst_15 : f32 to vector<16x128xf32>
    %32 = arith.mulf %31, %30 : vector<16x128xf32>
    %33 = math.exp %32 : vector<16x128xf32>
    %cst_16 = arith.constant 0.000000e+00 : f32
    %34 = vector.broadcast %cst_16 : f32 to vector<16x128xf32>
    %35 = arith.select %29, %33, %34 : vector<16x128xi1>, vector<16x128xf32>
    %c0_17 = arith.constant 0 : index
    %c0_18 = arith.constant 0 : index
    %36 = vector.load %arg4[%c0_17, %c0_18] : memref<128x128xf32, #tpu.memory_space<vmem>>, vector<128x128xf32>
    %cst_19 = arith.constant dense<0.000000e+00> : vector<16x128xf32>
    %37 = tpu.matmul %35, %36, %cst_19 {dimension_numbers = #tpu.dot_dimension_numbers<[1], [0], [0], [1], [0, 0, 1, 1], [], []>} : vector<16x128xf32>, vector<128x128xf32>, vector<16x128xf32> -> vector<16x128xf32>
    %cst_20 = arith.constant 0.000000e+00 : f32
    %38 = vector.broadcast %cst_20 : f32 to vector<16x128xf32>
    %39 = arith.maximumf %37, %38 : vector<16x128xf32>
    %cst_21 = arith.constant 0.000000e+00 : f32
    %40 = vector.broadcast %cst_21 : f32 to vector<16x128xf32>
    %41 = arith.cmpf ogt, %39, %40 : vector<16x128xf32>
    %cst_22 = arith.constant 1.000000e+00 : f32
    %42 = vector.broadcast %cst_22 : f32 to vector<16x128xf32>
    %43 = arith.select %41, %39, %42 : vector<16x128xi1>, vector<16x128xf32>
    %cst_23 = arith.constant 0.000000e+00 : f32
    %44 = vector.broadcast %cst_23 : f32 to vector<16x128xf32>
    %45 = arith.cmpf ogt, %39, %44 : vector<16x128xf32>
    %46 = math.log %43 : vector<16x128xf32>
    %cst_24 = arith.constant 6.000000e-01 : f32
    %47 = vector.broadcast %cst_24 : f32 to vector<16x128xf32>
    %48 = arith.mulf %47, %46 : vector<16x128xf32>
    %49 = math.exp %48 : vector<16x128xf32>
    %cst_25 = arith.constant 0.000000e+00 : f32
    %50 = vector.broadcast %cst_25 : f32 to vector<16x128xf32>
    %51 = arith.select %45, %49, %50 : vector<16x128xi1>, vector<16x128xf32>
    %c0_26 = arith.constant 0 : index
    %c0_27 = arith.constant 0 : index
    %52 = vector.load %arg3[%c0_26, %c0_27] : memref<128x128xf32, #tpu.memory_space<vmem>>, vector<128x128xf32>
    %cst_28 = arith.constant dense<0.000000e+00> : vector<16x128xf32>
    %53 = tpu.matmul %51, %52, %cst_28 {dimension_numbers = #tpu.dot_dimension_numbers<[1], [0], [0], [1], [0, 0, 1, 1], [], []>} : vector<16x128xf32>, vector<128x128xf32>, vector<16x128xf32> -> vector<16x128xf32>
    %cst_29 = arith.constant 0.000000e+00 : f32
    %54 = vector.broadcast %cst_29 : f32 to vector<16x128xf32>
    %55 = arith.maximumf %53, %54 : vector<16x128xf32>
    %cst_30 = arith.constant 0.000000e+00 : f32
    %56 = vector.broadcast %cst_30 : f32 to vector<16x128xf32>
    %57 = arith.cmpf ogt, %55, %56 : vector<16x128xf32>
    %cst_31 = arith.constant 1.000000e+00 : f32
    %58 = vector.broadcast %cst_31 : f32 to vector<16x128xf32>
    %59 = arith.select %57, %55, %58 : vector<16x128xi1>, vector<16x128xf32>
    %cst_32 = arith.constant 0.000000e+00 : f32
    %60 = vector.broadcast %cst_32 : f32 to vector<16x128xf32>
    %61 = arith.cmpf ogt, %55, %60 : vector<16x128xf32>
    %62 = math.log %59 : vector<16x128xf32>
    %cst_33 = arith.constant 6.000000e-01 : f32
    %63 = vector.broadcast %cst_33 : f32 to vector<16x128xf32>
    %64 = arith.mulf %63, %62 : vector<16x128xf32>
    %65 = math.exp %64 : vector<16x128xf32>
    %cst_34 = arith.constant 0.000000e+00 : f32
    %66 = vector.broadcast %cst_34 : f32 to vector<16x128xf32>
    %67 = arith.select %61, %65, %66 : vector<16x128xi1>, vector<16x128xf32>
    %c0_35 = arith.constant 0 : index
    %c0_36 = arith.constant 0 : index
    %68 = vector.load %arg5[%c0_35, %c0_36] : memref<16x128xf32, #tpu.memory_space<vmem>>, vector<16x128xf32>
    tpu.vector_store %arg5[%c0_35, %c0_36], %67 {strides = array<i32>} : memref<16x128xf32, #tpu.memory_space<vmem>>, vector<16x128xf32>,
    %c0_37 = arith.constant 0 : index
    %c0_38 = arith.constant 0 : index
    %69 = vector.load %arg6[%c0_37, %c0_38] : memref<16x128xf32, #tpu.memory_space<vmem>>, vector<16x128xf32>
    tpu.vector_store %arg6[%c0_37, %c0_38], %51 {strides = array<i32>} : memref<16x128xf32, #tpu.memory_space<vmem>>, vector<16x128xf32>,
    return
  }
  func.func @transform_0(%arg0: i32) -> (i32, i32) {
    %c0_i32 = arith.constant 0 : i32
    %c0_i32_0 = arith.constant 0 : i32
    return %arg0, %c0_i32 : i32, i32
  }
  func.func @transform_1(%arg0: i32) -> (i32, i32) {
    %c0_i32 = arith.constant 0 : i32
    %c0_i32_0 = arith.constant 0 : i32
    %c0_i32_1 = arith.constant 0 : i32
    return %c0_i32, %c0_i32_0 : i32, i32
  }
  func.func @transform_2(%arg0: i32) -> (i32, i32) {
    %c0_i32 = arith.constant 0 : i32
    %c0_i32_0 = arith.constant 0 : i32
    %c0_i32_1 = arith.constant 0 : i32
    return %c0_i32, %c0_i32_0 : i32, i32
  }
  func.func @transform_3(%arg0: i32) -> (i32, i32) {
    %c0_i32 = arith.constant 0 : i32
    %c0_i32_0 = arith.constant 0 : i32
    %c0_i32_1 = arith.constant 0 : i32
    return %c0_i32, %c0_i32_0 : i32, i32
  }
  func.func @transform_4(%arg0: i32) -> (i32, i32) {
    %c0_i32 = arith.constant 0 : i32
    %c0_i32_0 = arith.constant 0 : i32
    return %arg0, %c0_i32 : i32, i32
  }
  func.func @transform_5(%arg0: i32) -> (i32, i32) {
    %c0_i32 = arith.constant 0 : i32
    %c0_i32_0 = arith.constant 0 : i32
    return %arg0, %c0_i32 : i32, i32
  }
}

</mosaic_0001>

<bundles_post_ra>
// kernel: tpu_custom_call.1
= control target key start
LH: loop header
LB: loop body
LE: loop exit
PB: predicated region body
PF: predicated region fallthrough
CT: control target
= control target key end

     0   :  { %11 = vsyncpa [#allocation3], 0  ;;  %s1248_s0 = inlined_call_operand.hbm [shape: f32[16,128], index: 0, kind: input, shape index: {}]   ;;  %s1249_s1 = inlined_call_operand.hbm [shape: f32[128,256], index: 1, kind: input, shape index: {}]   ;;  %s1250_s2 = inlined_call_operand.hbm [shape: f32[128,128], index: 2, kind: input, shape index: {}]   ;;  %s1251_s3 = inlined_call_operand.hbm [shape: f32[128,128], index: 3, kind: input, shape index: {}]   ;;  %s1252_s4 = inlined_call_operand.hbm [shape: f32[16,128], index: 4, kind: output, shape index: {0}]   ;;  %s1253_s5 = inlined_call_operand.hbm [shape: f32[16,128], index: 5, kind: output, shape index: {1}]  }
   0x1   :  { %12 = vsyncpa [#allocation6], 0 }
   0x2   :  { %13 = vsyncpa [#allocation9], 0 }
   0x3   :  { %14 = vsyncpa [#allocation4], 0 }
   0x4   :  { %15 = vsyncpa [#allocation12], 0  ;;  %s1037_s18 = smov [#allocation5]   ;;  %s895_s22 = scalar_lea.hbm %s1249_s1, 4096 }
   0x5   :  { %s33_s19 = sshll.u32 %s1037_s18, 4  ;;  %p896_p0 = scmp.ne.s32.totalorder %s1249_s1, %s895_s22  ;;  %s34_s19 = int_to_ptr.vmem [resolvable:$true] %s33_s19 }
   0x6   :  { %p899_p1 = scmp.lt.u32.totalorder %s895_s22, %s1249_s1 }
   0x8   :  { %p901_p2 = pnand %p899_p1, %p896_p0 }
   0xa   :  { %904 = shalt.err (!%p901_p2)
}
   0xb   :  { %s905_s27 = scalar_lea.vmem %s34_s19, 4096  ;;  %p910_p4 = scmp.lt.s32.totalorder %s34_s19, %s34_s19 }
   0xc   :  { %p906_p3 = scmp.ne.s32.totalorder %s34_s19, %s905_s27  ;;  %p911_p5 = scmp.lt.s32.totalorder %s905_s27, %s905_s27 }
   0xe   :  { %p912_p6 = por %p911_p5, %p910_p4 }
  0x10   :  { %p913_p7 = pnand %p912_p6, %p906_p3 }
  0x12   :  { %916 = shalt.err (!%p913_p7)
}
  0x13   :  { %s1038_s28 = smov 256   ;;  %s1039_s29 = smov 16  }
  0x14   :  { %39 = dma.hbm_to_vmem [thread:$0]  %s1249_s1, 4096, %s34_s19, [#allocation6], %s1038_s28, %s1038_s28, %s1039_s29  }
  0x15   :  { %s1040_s7 = smov [#allocation2]   ;;  %s917_s11 = scalar_lea.hbm %s1248_s0, 256 }
  0x16   :  { %s21_s8 = sshll.u32 %s1040_s7, 4  ;;  %p918_p8 = scmp.ne.s32.totalorder %s1248_s0, %s917_s11  ;;  %s22_s8 = int_to_ptr.vmem [resolvable:$true] %s21_s8 }
  0x17   :  { %p921_p9 = scmp.lt.u32.totalorder %s917_s11, %s1248_s0 }
  0x19   :  { %p923_p10 = pnand %p921_p9, %p918_p8 }
  0x1b   :  { %926 = shalt.err (!%p923_p10)
}
  0x1c   :  { %s927_s16 = scalar_lea.vmem %s22_s8, 256  ;;  %p932_p12 = scmp.lt.s32.totalorder %s22_s8, %s22_s8 }
  0x1d   :  { %p928_p11 = scmp.ne.s32.totalorder %s22_s8, %s927_s16  ;;  %p933_p13 = scmp.lt.s32.totalorder %s927_s16, %s927_s16 }
  0x1f   :  { %p934_p0 = por %p933_p13, %p932_p12 }
  0x21   :  { %p935_p1 = pnand %p934_p0, %p928_p11 }
  0x23   :  { %938 = shalt.err (!%p935_p1)
}
  0x24   :  { %s1041_s1 = smov 128   ;;  %s1042_s17 = smov 8  }
  0x25   :  { %27 = dma.hbm_to_vmem [thread:$0]  %s1248_s0, 256, %s22_s8, [#allocation3], %s1041_s1, %s1041_s1, %s1042_s17  }
  0x26   :  { %s1043_s20 = smov [#allocation7]   ;;  %s1044_s22 = smov [#allocation8]  }
  0x27   :  { %s45_s21 = sshll.u32 %s1043_s20, 4  ;;  %s57_s23 = sshll.u32 %s1044_s22, 4  ;;  %s46_s21 = int_to_ptr.vmem [resolvable:$true] %s45_s21  ;;  %s1105_s23 = int_to_ptr.vmem [resolvable:$true] %s57_s23 }
  0x28   :  { %s939_s26 = scalar_lea.hbm %s1250_s2, 2048 }
  0x29   :  { %p940_p2 = scmp.ne.s32.totalorder %s1250_s2, %s939_s26  ;;  %p943_p3 = scmp.lt.u32.totalorder %s939_s26, %s1250_s2 }
  0x2b   :  { %p945_p4 = pnand %p943_p3, %p940_p2 }
  0x2d   :  { %948 = shalt.err (!%p945_p4)
}
  0x2e   :  { %s949_s0 = scalar_lea.vmem %s46_s21, 2048  ;;  %p954_p6 = scmp.lt.s32.totalorder %s46_s21, %s46_s21 }
  0x2f   :  { %p950_p5 = scmp.ne.s32.totalorder %s46_s21, %s949_s0  ;;  %p955_p7 = scmp.lt.s32.totalorder %s949_s0, %s949_s0 }
  0x31   :  { %p956_p8 = por %p955_p7, %p954_p6 }
  0x33   :  { %p957_p9 = pnand %p956_p8, %p950_p5 }
  0x35   :  { %960 = shalt.err (!%p957_p9)
}
  0x36   :  { %51 = dma.hbm_to_vmem [thread:$0]  %s1250_s2, 2048, %s46_s21, [#allocation6], %s1041_s1, %s1041_s1, %s1042_s17  }
  0x37   :  { %s961_s10 = scalar_lea.hbm %s1251_s3, 2048 }
  0x38   :  { %p962_p10 = scmp.ne.s32.totalorder %s1251_s3, %s961_s10  ;;  %p965_p11 = scmp.lt.u32.totalorder %s961_s10, %s1251_s3 }
  0x3a   :  { %p967_p12 = pnand %p965_p11, %p962_p10 }
  0x3c   :  { %970 = shalt.err (!%p967_p12)
}
  0x3d   :  { %s971_s15 = scalar_lea.vmem %s1105_s23, 2048  ;;  %p976_p0 = scmp.lt.s32.totalorder %s1105_s23, %s1105_s23 }
  0x3e   :  { %p972_p13 = scmp.ne.s32.totalorder %s1105_s23, %s971_s15  ;;  %p977_p1 = scmp.lt.s32.totalorder %s971_s15, %s971_s15 }
  0x40   :  { %p978_p2 = por %p977_p1, %p976_p0 }
  0x42   :  { %p979_p3 = pnand %p978_p2, %p972_p13 }
  0x44   :  { %982 = shalt.err (!%p979_p3)
}
  0x45   :  { %63 = dma.hbm_to_vmem [thread:$0]  %s1251_s3, 2048, %s1105_s23, [#allocation9], %s1041_s1, %s1041_s1, %s1042_s17  }
  0x46   :  { %1027 = dma.done.wait [#allocation3], 256  }
  0x47   :  { %1028 = vsyncadd [#allocation3], 4294967040 }
  0x48   :  { %1029 = dma.done.wait [#allocation6], 6144  }
  0x49   :  { %1030 = vsyncadd [#allocation6], 4294961152 }
  0x4a   :  { %1031 = dma.done.wait [#allocation9], 2048  }
  0x4b   :  { %1032 = vsyncadd [#allocation9], 4294965248  ;;  %v1045_v0 = vmov 0.0   ;;  %v79_v1 = vld [vmem:[#allocation5 + $0x8] sm:$0xff]  ;;  %v81_v2 = vld [vmem:[#allocation5 + $0x18] sm:$0xff]  ;;  %s1046_s3 = smov [#allocation11]  }
  0x4c   :  { %174 = vmatprep.mubr.f32.mxu0 %v1045_v0  ;;  %v78_v3 = vld [vmem:[#allocation5] sm:$0xff]  ;;  %v724_v4 = vpack.c.bf16 %v81_v2, %v79_v1  ;;  %v80_v5 = vld [vmem:[#allocation5 + $0x10] sm:$0xff]  ;;  %v83_v6 = vld [vmem:[#allocation5 + $0x28] sm:$0xff]  ;;  %s541_s18 = sshll.u32 %s1046_s3, 4  ;;  %s542_s18 = int_to_ptr.vmem [resolvable:$true] %s541_s18 }
  0x4d   :  { %v85_v7 = vld [vmem:[#allocation5 + $0x38] sm:$0xff]  ;;  %v726_v8 = vpack.c.bf16 %v80_v5, %v78_v3  ;;  %v82_v10 = vld [vmem:[#allocation5 + $0x20] sm:$0xff]  ;;  %v84_v11 = vld [vmem:[#allocation5 + $0x30] sm:$0xff]  ;;  %s983_s19 = scalar_lea.vmem %s542_s18, 256  ;;  %p988_p5 = scmp.lt.s32.totalorder %s542_s18, %s542_s18 }
  0x4e   :  { %v728_v9 = vpack.c.bf16 %v85_v7, %v83_v6  ;;  %v87_v12 = vld [vmem:[#allocation5 + $0x48] sm:$0xff]  ;;  %725 = vmatprep.subr.bf16.mxu0 %v724_v4  ;;  %v89_v13 = vld [vmem:[#allocation5 + $0x58] sm:$0xff]  ;;  %v730_v14 = vpack.c.bf16 %v84_v11, %v82_v10  ;;  %v86_v16 = vld [vmem:[#allocation5 + $0x40] sm:$0xff]  ;;  %p984_p4 = scmp.ne.s32.totalorder %s542_s18, %s983_s19  ;;  %p989_p6 = scmp.lt.s32.totalorder %s983_s19, %s983_s19 }
  0x4f   :  { %727 = vmatpush1.bf16.msra.mxu0 %v726_v8  ;;  %v732_v15 = vpack.c.bf16 %v89_v13, %v87_v12  ;;  %v88_v17 = vld [vmem:[#allocation5 + $0x50] sm:$0xff]  ;;  %v91_v18 = vld [vmem:[#allocation5 + $0x68] sm:$0xff]  ;;  %v93_v19 = vld [vmem:[#allocation5 + $0x78] sm:$0xff] }
  0x50   :  { %729 = vmatprep.subr.bf16.mxu0 %v728_v9  ;;  %v734_v20 = vpack.c.bf16 %v88_v17, %v86_v16  ;;  %v736_v21 = vpack.c.bf16 %v93_v19, %v91_v18  ;;  %v90_v22 = vld [vmem:[#allocation5 + $0x60] sm:$0xff]  ;;  %v92_v23 = vld [vmem:[#allocation5 + $0x70] sm:$0xff]  ;;  %v95_v24 = vld [vmem:[#allocation5 + $0x88] sm:$0xff]  ;;  %p990_p7 = por %p989_p6, %p988_p5 }
  0x51   :  { %v97_v25 = vld [vmem:[#allocation5 + $0x98] sm:$0xff]  ;;  %v738_v26 = vpack.c.bf16 %v92_v23, %v90_v22  ;;  %v94_v28 = vld [vmem:[#allocation5 + $0x80] sm:$0xff]  ;;  %v96_v29 = vld [vmem:[#allocation5 + $0x90] sm:$0xff] }
  0x52   :  { %v740_v27 = vpack.c.bf16 %v97_v25, %v95_v24  ;;  %v99_v30 = vld [vmem:[#allocation5 + $0xa8] sm:$0xff]  ;;  %v101_v31 = vld [vmem:[#allocation5 + $0xb8] sm:$0xff]  ;;  %v742_v32 = vpack.c.bf16 %v96_v29, %v94_v28  ;;  %v98_v34 = vld [vmem:[#allocation5 + $0xa0] sm:$0xff]  ;;  %p991_p8 = pnand %p990_p7, %p984_p4 }
  0x53   :  { %731 = vmatpush1.bf16.msra.mxu0 %v730_v14  ;;  %v744_v33 = vpack.c.bf16 %v101_v31, %v99_v30  ;;  %v100_v35 = vld [vmem:[#allocation5 + $0xb0] sm:$0xff]  ;;  %v103_v36 = vld [vmem:[#allocation5 + $0xc8] sm:$0xff]  ;;  %v105_v37 = vld [vmem:[#allocation5 + $0xd8] sm:$0xff] }
  0x54   :  { %733 = vmatprep.subr.bf16.mxu0 %v732_v15  ;;  %v746_v38 = vpack.c.bf16 %v100_v35, %v98_v34  ;;  %v748_v39 = vpack.c.bf16 %v105_v37, %v103_v36  ;;  %v102_v40 = vld [vmem:[#allocation5 + $0xc0] sm:$0xff]  ;;  %v104_v41 = vld [vmem:[#allocation5 + $0xd0] sm:$0xff]  ;;  %v107_v42 = vld [vmem:[#allocation5 + $0xe8] sm:$0xff] }
  0x55   :  { %v109_v43 = vld [vmem:[#allocation5 + $0xf8] sm:$0xff]  ;;  %v750_v44 = vpack.c.bf16 %v104_v41, %v102_v40  ;;  %v106_v46 = vld [vmem:[#allocation5 + $0xe0] sm:$0xff]  ;;  %v108_v47 = vld [vmem:[#allocation5 + $0xf0] sm:$0xff] }
  0x56   :  { %v752_v45 = vpack.c.bf16 %v109_v43, %v107_v42  ;;  %v754_v48 = vpack.c.bf16 %v108_v47, %v106_v46  ;;  %v76_v49 = vld [vmem:[#allocation2] sm:$0xff]  ;;  %v77_v50 = vld [vmem:[#allocation2 + $0x8] sm:$0xff]  ;;  %v209_v51 = vld [vmem:[#allocation7] sm:$0xff] }
  0x57   :  { %735 = vmatpush1.bf16.msra.mxu0 %v734_v20  ;;  %v210_v52 = vld [vmem:[#allocation7 + $0x8] sm:$0xff]  ;;  %v211_v54 = vld [vmem:[#allocation7 + $0x10] sm:$0xff]  ;;  %v212_v55 = vld [vmem:[#allocation7 + $0x18] sm:$0xff] }
  0x58   :  { %737 = vmatprep.subr.bf16.mxu0 %v736_v21  ;;  %v1144_v53 = vpack.c.bf16 %v210_v52, %v209_v51  ;;  %v213_v56 = vld [vmem:[#allocation7 + $0x20] sm:$0xff]  ;;  %v1148_v57 = vpack.c.bf16 %v212_v55, %v211_v54  ;;  %v214_v58 = vld [vmem:[#allocation7 + $0x28] sm:$0xff]  ;;  %v215_v60 = vld [vmem:[#allocation7 + $0x30] sm:$0xff] }
  0x59   :  { %v1150_v59 = vpack.c.bf16 %v214_v58, %v213_v56  ;;  %v216_v61 = vld [vmem:[#allocation7 + $0x38] sm:$0xff]  ;;  %v217_v63 = vld [vmem:[#allocation7 + $0x40] sm:$0xff]  ;;  %v219_v2 = vld [vmem:[#allocation7 + $0x50] sm:$0xff] }
  0x5a   :  { %757 = vmatprep.subr.bf16.mxu1 %v1144_v53  ;;  %v768_v62 = vpack.c.bf16 %v216_v61, %v215_v60  ;;  %v220_v3 = vld [vmem:[#allocation7 + $0x58] sm:$0xff]  ;;  %v221_v5 = vld [vmem:[#allocation7 + $0x60] sm:$0xff]  ;;  %v222_v6 = vld [vmem:[#allocation7 + $0x68] sm:$0xff] }
  0x5b   :  { %739 = vmatpush1.bf16.msra.mxu0 %v738_v26  ;;  %759 = vmatpush3.bf16.msra.mxu1 %v1144_v53  ;;  %v776_v4 = vpack.c.bf16 %v220_v3, %v219_v2  ;;  %v780_v7 = vpack.c.bf16 %v222_v6, %v221_v5  ;;  %v223_v8 = vld [vmem:[#allocation7 + $0x70] sm:$0xff]  ;;  %v224_v9 = vld [vmem:[#allocation7 + $0x78] sm:$0xff]  ;;  %v319_v34 = vld [vmem:[#allocation8 + $0x8] sm:$0xff] }
  0x5c   :  { %741 = vmatprep.subr.bf16.mxu0 %v740_v27  ;;  %761 = vmatprep.subr.bf16.mxu1 %v1148_v57  ;;  %v784_v10 = vpack.c.bf16 %v224_v9, %v223_v8  ;;  %v320_v36 = vld [vmem:[#allocation8 + $0x10] sm:$0xff]  ;;  %v321_v37 = vld [vmem:[#allocation8 + $0x18] sm:$0xff]  ;;  %v323_v40 = vld [vmem:[#allocation8 + $0x28] sm:$0xff] }
  0x5d   :  { %v324_v42 = vld [vmem:[#allocation8 + $0x30] sm:$0xff]  ;;  %v325_v43 = vld [vmem:[#allocation8 + $0x38] sm:$0xff]  ;;  %v327_v46 = vld [vmem:[#allocation8 + $0x48] sm:$0xff] }
  0x5e   :  { %v330_v51 = vld [vmem:[#allocation8 + $0x60] sm:$0xff]  ;;  %v331_v52 = vld [vmem:[#allocation8 + $0x68] sm:$0xff]  ;;  %v333_v55 = vld [vmem:[#allocation8 + $0x78] sm:$0xff] }
  0x5f   :  { %743 = vmatpush1.bf16.msra.mxu0 %v742_v32  ;;  %763 = vmatpush3.bf16.msra.mxu1 %v1148_v57  ;;  %v812_v54 = vpack.c.bf16 %v331_v52, %v330_v51 }
  0x60   :  { %745 = vmatprep.subr.bf16.mxu0 %v744_v33  ;;  %765 = vmatprep.subr.bf16.mxu1 %v1150_v59  ;;  %v318_v33 = vld [vmem:[#allocation8] sm:$0xff] }
  0x61   :  { %v788_v35 = vpack.c.bf16 %v319_v34, %v318_v33 }
  0x63   :  { %747 = vmatpush1.bf16.msra.mxu0 %v746_v38  ;;  %767 = vmatpush3.bf16.msra.mxu1 %v1150_v59  ;;  %v792_v38 = vpack.c.bf16 %v321_v37, %v320_v36 }
  0x64   :  { %749 = vmatprep.subr.bf16.mxu0 %v748_v39  ;;  %769 = vmatprep.subr.bf16.mxu1 %v768_v62  ;;  %v322_v39 = vld [vmem:[#allocation8 + $0x20] sm:$0xff] }
  0x65   :  { %v796_v41 = vpack.c.bf16 %v323_v40, %v322_v39 }
  0x67   :  { %751 = vmatpush1.bf16.msra.mxu0 %v750_v44  ;;  %771 = vmatpush3.bf16.msra.mxu1 %v768_v62  ;;  %v800_v44 = vpack.c.bf16 %v325_v43, %v324_v42 }
  0x68   :  { %753 = vmatprep.subr.bf16.mxu0 %v752_v45  ;;  %v326_v45 = vld [vmem:[#allocation8 + $0x40] sm:$0xff] }
  0x69   :  { %v804_v47 = vpack.c.bf16 %v327_v46, %v326_v45 }
  0x6b   :  { %755 = vmatpush1.bf16.msra.mxu0 %v754_v48  ;;  %v328_v48 = vld [vmem:[#allocation8 + $0x50] sm:$0xff] }
  0x6c   :  { %789 = vmatprep.subr.bf16.mxu0 %v788_v35 }
  0x6e   :  { %175 = vmatmul.mubr.f32.vlgmr.msra.gmra.mrb[0].mxu0 %v76_v49  ;;  %v329_v49 = vld [vmem:[#allocation8 + $0x58] sm:$0xff] }
  0x6f   :  { %180 = vmatprep.mubr.f32.mxu0 %v1045_v0  ;;  %v218_v0 = vld [vmem:[#allocation7 + $0x48] sm:$0xff]  ;;  %791 = vmatpush3.bf16.msra.mxu0 %v788_v35 }
  0x70   :  { %v772_v1 = vpack.c.bf16 %v218_v0, %v217_v63  ;;  %793 = vmatprep.subr.bf16.mxu0 %v792_v38 }
  0x72   :  { %181 = vmatmul.mubr.f32.gmra.mrb[2].mxu0 %v77_v50  ;;  %773 = vmatprep.subr.bf16.mxu1 %v772_v1  ;;  %v808_v50 = vpack.c.bf16 %v329_v49, %v328_v48 }
  0x73   :  { %775 = vmatpush3.bf16.msra.mxu1 %v772_v1  ;;  %795 = vmatpush3.bf16.msra.mxu0 %v792_v38 }
  0x74   :  { %777 = vmatprep.subr.bf16.mxu1 %v776_v4  ;;  %797 = vmatprep.subr.bf16.mxu0 %v796_v41 }
  0x77   :  { %779 = vmatpush3.bf16.msra.mxu1 %v776_v4  ;;  %799 = vmatpush3.bf16.msra.mxu0 %v796_v41 }
  0x78   :  { %781 = vmatprep.subr.bf16.mxu1 %v780_v7  ;;  %801 = vmatprep.subr.bf16.mxu0 %v800_v44 }
  0x7b   :  { %783 = vmatpush3.bf16.msra.mxu1 %v780_v7  ;;  %803 = vmatpush3.bf16.msra.mxu0 %v800_v44 }
  0x7c   :  { %785 = vmatprep.subr.bf16.mxu1 %v784_v10  ;;  %805 = vmatprep.subr.bf16.mxu0 %v804_v47 }
  0x7f   :  { %787 = vmatpush3.bf16.msra.mxu1 %v784_v10  ;;  %807 = vmatpush3.bf16.msra.mxu0 %v804_v47 }
  0x80   :  { %821 = vmatprep.subr.bf16.mxu1 %v1144_v53  ;;  %809 = vmatprep.subr.bf16.mxu0 %v808_v50 }
  0x83   :  { %811 = vmatpush3.bf16.msra.mxu0 %v808_v50 }
  0x84   :  { %813 = vmatprep.subr.bf16.mxu0 %v812_v54 }
  0x87   :  { %815 = vmatpush3.bf16.msra.mxu0 %v812_v54 }
 0x141   :  { %v176_v11 = vpop.f32.mrb[0].mxu0 }
 0x142   :  { %v187_v12 = vmul.f32 %v176_v11, %v176_v11  ;;  %v178_v13 = vpop.f32.mrb[1].mxu0 }
 0x143   :  { %v189_v14 = vmul.f32 %v178_v13, %v178_v13 }
 0x145   :  { %v182_v15 = vpop.f32.mrb[2].mxu0  ;;  %v191_v16 = vadd.f32 %v189_v14, %v187_v12 }
 0x146   :  { %v188_v17 = vmul.f32 %v182_v15, %v182_v15  ;;  %v184_v18 = vpop.f32.mrb[3].mxu0 }
 0x147   :  { %v190_v19 = vmul.f32 %v184_v18, %v184_v18  ;;  %vm193_vm0 = vcmp.gt.f32.partialorder %v191_v16, 0.0 }
 0x148   :  { %v195_v20 = vsel %vm193_vm0, %v191_v16, 1.0 }
 0x149   :  { %v192_v21 = vadd.f32 %v190_v19, %v188_v17  ;;  %863 = vlog2.f32 %v195_v20 }
 0x14b   :  { %vm194_vm1 = vcmp.gt.f32.partialorder %v192_v21, 0.0 }
 0x14c   :  { %v196_v22 = vsel %vm194_vm1, %v192_v21, 1.0 }
 0x14d   :  { %865 = vlog2.f32 %v196_v22 }
 0x153   :  { %v864_v23 = vpop.eup %863 }
 0x154   :  { %v198_v24 = vmul.f32 0.6931472, %v864_v23 }
 0x156   :  { %v201_v25 = vmul.f32 0.24, %v198_v24 }
 0x157   :  { %v866_v26 = vpop.eup %865 }
 0x158   :  { %v203_v27 = vmul.f32 1.442695, %v201_v25  ;;  %v200_v28 = vmul.f32 0.6931472, %v866_v26 }
 0x15a   :  { %867 = vpow2.f32 %v203_v27  ;;  %v202_v29 = vmul.f32 0.24, %v200_v28 }
 0x15c   :  { %v205_v30 = vmul.f32 1.442695, %v202_v29 }
 0x15e   :  { %869 = vpow2.f32 %v205_v30 }
 0x164   :  { %v868_v31 = vpop.eup %867 }
 0x165   :  { %651 = vmatprep.mubr.msk.f32.mxu1 %vm193_vm0, %v868_v31 }
 0x168   :  { %v870_v32 = vpop.eup %869 }
 0x169   :  { %652 = vmatmul.mubr.msk.f32.vlgmr.msra.gmra.mrb[0].mxu1 %vm194_vm1, %v870_v32 }
 0x16a   :  { %823 = vmatpush3.bf16.msra.mxu1 %v1144_v53  ;;  %v332_v53 = vld [vmem:[#allocation8 + $0x70] sm:$0xff] }
 0x16b   :  { %825 = vmatprep.subr.bf16.mxu1 %v1148_v57  ;;  %v816_v56 = vpack.c.bf16 %v333_v55, %v332_v53 }
 0x16d   :  { %817 = vmatprep.subr.bf16.mxu0 %v816_v56 }
 0x16e   :  { %827 = vmatpush3.bf16.msra.mxu1 %v1148_v57  ;;  %819 = vmatpush3.bf16.msra.mxu0 %v816_v56 }
 0x16f   :  { %829 = vmatprep.subr.bf16.mxu1 %v1150_v59 }
 0x172   :  { %831 = vmatpush3.bf16.msra.mxu1 %v1150_v59 }
 0x173   :  { %833 = vmatprep.subr.bf16.mxu1 %v768_v62 }
 0x176   :  { %835 = vmatpush3.bf16.msra.mxu1 %v768_v62 }
 0x177   :  { %837 = vmatprep.subr.bf16.mxu1 %v772_v1 }
 0x17a   :  { %839 = vmatpush3.bf16.msra.mxu1 %v772_v1 }
 0x17b   :  { %841 = vmatprep.subr.bf16.mxu1 %v776_v4 }
 0x17e   :  { %843 = vmatpush3.bf16.msra.mxu1 %v776_v4 }
 0x17f   :  { %845 = vmatprep.subr.bf16.mxu1 %v780_v7 }
 0x182   :  { %847 = vmatpush3.bf16.msra.mxu1 %v780_v7 }
 0x183   :  { %849 = vmatprep.subr.bf16.mxu1 %v784_v10 }
 0x186   :  { %851 = vmatpush3.bf16.msra.mxu1 %v784_v10 }
 0x23c   :  { %v653_v57 = vpop.f32.mrb[0].mxu1 }
 0x23d   :  { %v301_v58 = vmax.f32 %v653_v57, 0.0  ;;  %v291_v59 = vpop.f32.mrb[1].mxu1 }
 0x23e   :  { %v300_v60 = vmax.f32 %v291_v59, 0.0 }
 0x23f   :  { %vm1166_vm2 = vcmp.gt.f32.partialorder %v301_v58, 0.0 }
 0x240   :  { %v305_v62 = vsel %vm1166_vm2, %v301_v58, 1.0  ;;  %vm1172_vm3 = vcmp.gt.f32.partialorder %v300_v60, 0.0 }
 0x241   :  { %871 = vlog2.f32 %v305_v62  ;;  %v304_v0 = vsel %vm1172_vm3, %v300_v60, 1.0 }
 0x242   :  { %873 = vlog2.f32 %v304_v0 }
 0x24b   :  { %v872_v1 = vpop.eup %871 }
 0x24c   :  { %v874_v2 = vpop.eup %873  ;;  %v309_v3 = vmul.f32 0.6931472, %v872_v1 }
 0x24d   :  { %v307_v4 = vmul.f32 0.6931472, %v874_v2 }
 0x24e   :  { %v311_v5 = vmul.f32 0.6, %v309_v3 }
 0x24f   :  { %v310_v6 = vmul.f32 0.6, %v307_v4 }
 0x250   :  { %v314_v7 = vmul.f32 1.442695, %v311_v5 }
 0x251   :  { %v312_v8 = vmul.f32 1.442695, %v310_v6 }
 0x253   :  { %875 = vpow2.f32 %v312_v8 }
 0x254   :  { %877 = vpow2.f32 %v314_v7 }
 0x25d   :  { %v876_v9 = vpop.eup %875 }
 0x25e   :  { %v878_v10 = vpop.eup %877  ;;  %686 = vmatprep.mubr.msk.f32.mxu0 %vm1172_vm3, %v876_v9 }
 0x25f   :  { %687 = vmatmul.mubr.msk.f32.vlgmr.msra.gmra.mrb[4].mxu0 %vm1166_vm2, %v878_v10 }
 0x332   :  { %v688_v11 = vpop.f32.mrb[4].mxu0 }
 0x333   :  { %v410_v12 = vmax.f32 %v688_v11, 0.0  ;;  %v400_v13 = vpop.f32.mrb[5].mxu0 }
 0x334   :  { %v409_v14 = vmax.f32 %v400_v13, 0.0 }
 0x335   :  { %vm1182_vm4 = vcmp.gt.f32.partialorder %v410_v12, 0.0 }
 0x336   :  { %v414_v16 = vsel %vm1182_vm4, %v410_v12, 1.0  ;;  %vm1188_vm5 = vcmp.gt.f32.partialorder %v409_v14, 0.0 }
 0x337   :  { %879 = vlog2.f32 %v414_v16  ;;  %v413_v18 = vsel %vm1188_vm5, %v409_v14, 1.0 }
 0x338   :  { %881 = vlog2.f32 %v413_v18 }
 0x341   :  { %v880_v19 = vpop.eup %879 }
 0x342   :  { %v882_v20 = vpop.eup %881  ;;  %v418_v21 = vmul.f32 0.6931472, %v880_v19 }
 0x343   :  { %v416_v22 = vmul.f32 0.6931472, %v882_v20 }
 0x344   :  { %v420_v23 = vmul.f32 0.6, %v418_v21 }
 0x345   :  { %v419_v24 = vmul.f32 0.6, %v416_v22 }
 0x346   :  { %v423_v25 = vmul.f32 1.442695, %v420_v23 }
 0x347   :  { %v421_v26 = vmul.f32 1.442695, %v419_v24 }
 0x348   :  { %883 = vpow2.f32 %v423_v25 }
 0x349   :  { %885 = vpow2.f32 %v421_v26 }
 0x352   :  { %v884_v27 = vpop.eup %883 }
 0x353   :  { %v886_v28 = vpop.eup %885  ;;  %v426_v29 = vsel %vm1182_vm4, %v884_v27, 0.0 }
 0x354   :  { %v425_v30 = vsel %vm1188_vm5, %v886_v28, 0.0  ;;  %721 = vmatprep.mubr.msk.f32.mxu1 %vm1188_vm5, %v886_v28  ;;  %523 = vst [vmem:[#allocation11 + $0x8] sm:$0xff] %v426_v29 }
 0x355   :  { %522 = vst [vmem:[#allocation11] sm:$0xff] %v425_v30  ;;  %722 = vmatmul.mubr.msk.f32.vlgmr.msra.gmra.mrb[2].mxu1 %vm1182_vm4, %v884_v27 }
 0x356   :  { %994 = shalt.err (!%p991_p8)
}
 0x357   :  { %s995_s22 = scalar_lea.hbm %s1253_s5, 256 }
 0x358   :  { %p996_p9 = scmp.ne.s32.totalorder %s1253_s5, %s995_s22  ;;  %p999_p10 = scmp.lt.u32.totalorder %s995_s22, %s1253_s5 }
 0x35a   :  { %p1001_p11 = pnand %p999_p10, %p996_p9 }
 0x35c   :  { %1004 = shalt.err (!%p1001_p11)
}
 0x35d   :  { %547 = dma.vmem_to_hbm [thread:$0]  %s542_s18, 256, %s1253_s5, [#allocation12], %s1041_s1, %s1041_s1, %s1042_s17  }
 0x35e   :  { %s1047_s5 = smov [#allocation10]  }
 0x35f   :  { %s529_s29 = sshll.u32 %s1047_s5, 4  ;;  %s530_s29 = int_to_ptr.vmem [resolvable:$true] %s529_s29 }
 0x360   :  { %s1005_s30 = scalar_lea.vmem %s530_s29, 256  ;;  %p1010_p13 = scmp.lt.s32.totalorder %s530_s29, %s530_s29 }
 0x361   :  { %p1006_p12 = scmp.ne.s32.totalorder %s530_s29, %s1005_s30  ;;  %p1011_p0 = scmp.lt.s32.totalorder %s1005_s30, %s1005_s30 }
 0x363   :  { %p1012_p1 = por %p1011_p0, %p1010_p13 }
 0x365   :  { %p1013_p2 = pnand %p1012_p1, %p1006_p12 }
 0x428   :  { %v723_v31 = vpop.f32.mrb[2].mxu1 }
 0x429   :  { %v503_v32 = vmax.f32 %v723_v31, 0.0  ;;  %v493_v33 = vpop.f32.mrb[3].mxu1 }
 0x42a   :  { %v502_v34 = vmax.f32 %v493_v33, 0.0 }
 0x42b   :  { %vm1217_vm6 = vcmp.gt.f32.partialorder %v503_v32, 0.0 }
 0x42c   :  { %v507_v36 = vsel %vm1217_vm6, %v503_v32, 1.0  ;;  %vm1223_vm7 = vcmp.gt.f32.partialorder %v502_v34, 0.0 }
 0x42d   :  { %887 = vlog2.f32 %v507_v36  ;;  %v506_v38 = vsel %vm1223_vm7, %v502_v34, 1.0 }
 0x42e   :  { %889 = vlog2.f32 %v506_v38 }
 0x437   :  { %v888_v39 = vpop.eup %887 }
 0x438   :  { %v890_v40 = vpop.eup %889  ;;  %v511_v41 = vmul.f32 0.6931472, %v888_v39 }
 0x439   :  { %v509_v42 = vmul.f32 0.6931472, %v890_v40 }
 0x43a   :  { %v513_v43 = vmul.f32 0.6, %v511_v41 }
 0x43b   :  { %v512_v44 = vmul.f32 0.6, %v509_v42 }
 0x43c   :  { %v516_v45 = vmul.f32 1.442695, %v513_v43 }
 0x43d   :  { %v514_v46 = vmul.f32 1.442695, %v512_v44 }
 0x43e   :  { %891 = vpow2.f32 %v516_v45 }
 0x43f   :  { %893 = vpow2.f32 %v514_v46 }
 0x448   :  { %v892_v47 = vpop.eup %891 }
 0x449   :  { %v894_v48 = vpop.eup %893  ;;  %v519_v49 = vsel %vm1217_vm6, %v892_v47, 0.0 }
 0x44a   :  { %521 = vst [vmem:[#allocation10 + $0x8] sm:$0xff] %v519_v49  ;;  %v518_v50 = vsel %vm1223_vm7, %v894_v48, 0.0 }
 0x44b   :  { %520 = vst [vmem:[#allocation10] sm:$0xff] %v518_v50 }
 0x44c   :  { %1016 = shalt.err (!%p1013_p2)
}
 0x44d   :  { %s1017_s7 = scalar_lea.hbm %s1252_s4, 256 }
 0x44e   :  { %p1018_p3 = scmp.ne.s32.totalorder %s1252_s4, %s1017_s7  ;;  %p1021_p4 = scmp.lt.u32.totalorder %s1017_s7, %s1252_s4 }
 0x450   :  { %p1023_p5 = pnand %p1021_p4, %p1018_p3 }
 0x452   :  { %1026 = shalt.err (!%p1023_p5)
}
 0x453   :  { %535 = dma.vmem_to_hbm [thread:$0]  %s530_s29, 256, %s1252_s4, [#allocation4], %s1041_s1, %s1041_s1, %s1042_s17  }
 0x454   :  { %1033 = dma.done.wait [#allocation4], 256  }
 0x455   :  { %1034 = vsyncadd [#allocation4], 4294967040 }
 0x456   :  { %1035 = dma.done.wait [#allocation12], 256  }
 0x457   :  { %1036 = vsyncadd [#allocation12], 4294967040 }
 0x458   :  { %554 = vsyncpa [#allocation3], 1 }
 0x459   :  { %555 = vsyncpa [#allocation6], 1 }
 0x45a   :  { %556 = vsyncpa [#allocation9], 1 }
 0x45b   :  { %557 = vsyncpa [#allocation4], 1 }
 0x45c   :  { %558 = vsyncpa [#allocation12], 1 }

</bundles_post_ra>
